<compile_context>
chip_gen: v5e
topology: v5e:2x2
jax: 0.10.0
libtpu: 0.0.40
codegen_flags: <defaults>
</compile_context>

<pallas_src>
import functools

import jax
import jax.numpy as jnp
from jax.experimental import pallas as pl
from jax.experimental.pallas import tpu as pltpu


def _general_relu_kernel(x_ref, o_ref, *, leak, sub, cutoff):
    x = x_ref[...]
    if leak is not None:
        # F.leaky_relu(x, leak); scalar applied in the tensor dtype, matching
        # PyTorch tensor-scalar semantics.
        y = jnp.where(x >= 0, x, x * jnp.asarray(leak, x.dtype))
    else:
        # F.relu(x)
        y = jnp.maximum(x, jnp.asarray(0, x.dtype))
    if sub is not None:
        y = y - jnp.asarray(sub, y.dtype)                 # x.sub_(sub)
    if cutoff is not None:
        y = jnp.minimum(y, jnp.asarray(cutoff, y.dtype))  # x.clamp_max_(cutoff)
    o_ref[...] = y


_LANE_CANDIDATES = (4096, 2048, 1024, 512, 256, 128)
_TARGET_BLOCK_BYTES = 4 * 1024 * 1024  # ~4 MiB/block; 4x buffered = ~16 MiB


def _choose_lane(n_elems, sub_mult):
    """Widest lane-dense last dim (multiple of 128) dividing n_elems,
    preferring one whose row count is already sublane-aligned."""
    for cand in _LANE_CANDIDATES:          # prefer sublane-aligned row counts
        if n_elems % cand == 0 and (n_elems // cand) % sub_mult == 0:
            return cand
    for cand in _LANE_CANDIDATES:          # at least avoid element padding
        if n_elems % cand == 0:
            return cand
    return 128                             # ragged fallback (needs padding)


def general_relu(x, leak=None, sub_value=None, value_cutoff=None):
    """Elementwise GeneralReLU on any-shaped tensor via a Pallas TPU kernel."""
    orig_shape = x.shape
    orig_dtype = x.dtype
    n_elems = x.size
    itemsize = jnp.dtype(orig_dtype).itemsize

    # dtype-aware sublane multiple: 8 (f32) / 16 (bf16/f16) / 32 (int8/fp8)
    sub_mult = 8 * max(1, 4 // itemsize)

    lane = _choose_lane(n_elems, sub_mult)
    rows = pl.cdiv(n_elems, lane)
    rows_aligned = pl.cdiv(rows, sub_mult) * sub_mult
    padded_elems = rows_aligned * lane

    x_flat = jnp.ravel(x)                  # contiguous reshape: no HBM copy
    if padded_elems != n_elems:
        # TODO(synk): ragged-size fallback costs one extra HBM pass (pad+slice).
        x_flat = jnp.pad(x_flat, (0, padded_elems - n_elems))
    x2d = x_flat.reshape(rows_aligned, lane)

    # Big, dtype/lane-aware row block, clamped so it never exceeds the slab.
    block_rows = (_TARGET_BLOCK_BYTES // (lane * itemsize)) // sub_mult * sub_mult
    block_rows = max(sub_mult, min(block_rows, rows_aligned))

    grid = (pl.cdiv(rows_aligned, block_rows),)

    kernel = functools.partial(
        _general_relu_kernel, leak=leak, sub=sub_value, cutoff=value_cutoff
    )

    out2d = pl.pallas_call(
        kernel,
        out_shape=jax.ShapeDtypeStruct((rows_aligned, lane), orig_dtype),
        grid_spec=pltpu.PrefetchScalarGridSpec(
            num_scalar_prefetch=0,
            grid=grid,
            in_specs=[pl.BlockSpec((block_rows, lane), lambda i: (i, 0))],
            out_specs=pl.BlockSpec((block_rows, lane), lambda i: (i, 0)),
        ),
        compiler_params=pltpu.CompilerParams(
            dimension_semantics=("parallel",),      # shards across TCs on v7x
            vmem_limit_bytes=32 * 1024 * 1024,      # safe on v5e/v6e/v7x
        ),
    )(x2d)

    out_flat = out2d.reshape(-1)           # contiguous reshape: no HBM copy
    if padded_elems != n_elems:
        out_flat = out_flat[:n_elems]
    return out_flat.reshape(orig_shape)


def general_relu_reference(x, leak=None, sub_value=None, value_cutoff=None):
    """Pure-JAX reference matching the PyTorch forward semantics."""
    if leak is not None:
        y = jnp.where(x >= 0, x, x * leak)
    else:
        y = jnp.maximum(x, 0)
    if sub_value is not None:
        y = y - sub_value
    if value_cutoff is not None:
        y = jnp.minimum(y, value_cutoff)
    return y


if __name__ == "__main__":
    # GeneralReLU has no learnable parameters; only scalar hyperparameters.
    leak, sub_value, value_cutoff = 0.1, 0.4, 6.0

    key = jax.random.PRNGKey(0)
    x = jax.random.normal(key, (2, 4, 16, 16), dtype=jnp.float32)  # NCHW

    out = general_relu(x, leak=leak, sub_value=sub_value,
                       value_cutoff=value_cutoff)
    out = jax.block_until_ready(out)

    ref = general_relu_reference(x, leak=leak, sub_value=sub_value,
                                 value_cutoff=value_cutoff)
    assert out.shape == x.shape and out.dtype == x.dtype
    assert jnp.allclose(out, ref, atol=1e-6), "mismatch vs reference (f32)"

    # Plain-ReLU path (leak=None, no sub/cutoff).
    out2 = jax.block_until_ready(general_relu(x))
    assert jnp.allclose(out2, general_relu_reference(x), atol=1e-6)

    # bf16 path exercises the dtype-aware (16,128) sublane blocking.
    xb = x.astype(jnp.bfloat16)
    out3 = jax.block_until_ready(
        general_relu(xb, leak=leak, sub_value=sub_value,
                     value_cutoff=value_cutoff))
    ref3 = general_relu_reference(xb, leak=leak, sub_value=sub_value,
                                  value_cutoff=value_cutoff)
    assert out3.dtype == jnp.bfloat16
    assert jnp.allclose(out3.astype(jnp.float32), ref3.astype(jnp.float32),
                        atol=2e-2), "mismatch vs reference (bf16)"

    # Ragged-size path (forces the pad+slice fallback) for robustness.
    xr = jax.random.normal(jax.random.PRNGKey(1), (3, 5, 7), dtype=jnp.float32)
    out4 = jax.block_until_ready(
        general_relu(xr, leak=leak, sub_value=sub_value,
                     value_cutoff=value_cutoff))
    ref4 = general_relu_reference(xr, leak=leak, sub_value=sub_value,
                                  value_cutoff=value_cutoff)
    assert out4.shape == xr.shape
    assert jnp.allclose(out4, ref4, atol=1e-6), "mismatch vs reference (ragged)"

    print("KERNEL_OK")
</pallas_src>

<mosaic_0001>
module attributes {stable_mosaic.version = 11 : i64} {
  func.func @_general_relu_kernel(%arg0: i32, %arg1: memref<8x256xf32, #tpu.memory_space<vmem>>, %arg2: memref<8x256xf32, #tpu.memory_space<vmem>>) attributes {dimension_semantics = [#tpu.dimension_semantics<parallel>], iteration_bounds = array<i64: 1>, scalar_prefetch = 0 : i64, scratch_operands = 0 : i64, tpu.core_type = #tpu.core_type<tc>, window_params = [{transform_indices = @transform_0, window_bounds = array<i64: 8, 256>}, {transform_indices = @transform_1, window_bounds = array<i64: 8, 256>}]} {
    %c0 = arith.constant 0 : index
    %c0_0 = arith.constant 0 : index
    %0 = vector.load %arg1[%c0, %c0_0] : memref<8x256xf32, #tpu.memory_space<vmem>>, vector<8x256xf32>
    %cst = arith.constant 0.000000e+00 : f32
    %1 = vector.broadcast %cst : f32 to vector<8x256xf32>
    %2 = arith.cmpf oge, %0, %1 : vector<8x256xf32>
    %cst_1 = arith.constant 1.000000e-01 : f32
    %3 = vector.broadcast %cst_1 : f32 to vector<8x256xf32>
    %4 = arith.mulf %0, %3 : vector<8x256xf32>
    %5 = arith.select %2, %0, %4 : vector<8x256xi1>, vector<8x256xf32>
    %cst_2 = arith.constant 4.000000e-01 : f32
    %6 = vector.broadcast %cst_2 : f32 to vector<8x256xf32>
    %7 = arith.subf %5, %6 : vector<8x256xf32>
    %cst_3 = arith.constant 6.000000e+00 : f32
    %8 = vector.broadcast %cst_3 : f32 to vector<8x256xf32>
    %9 = arith.minimumf %7, %8 : vector<8x256xf32>
    %c0_4 = arith.constant 0 : index
    %c0_5 = arith.constant 0 : index
    %10 = vector.load %arg2[%c0_4, %c0_5] : memref<8x256xf32, #tpu.memory_space<vmem>>, vector<8x256xf32>
    tpu.vector_store %arg2[%c0_4, %c0_5], %9 {strides = array<i32>} : memref<8x256xf32, #tpu.memory_space<vmem>>, vector<8x256xf32>,
    return
  }
  func.func @transform_0(%arg0: i32) -> (i32, i32) {
    %c0_i32 = arith.constant 0 : i32
    %c0_i32_0 = arith.constant 0 : i32
    return %arg0, %c0_i32 : i32, i32
  }
  func.func @transform_1(%arg0: i32) -> (i32, i32) {
    %c0_i32 = arith.constant 0 : i32
    %c0_i32_0 = arith.constant 0 : i32
    return %arg0, %c0_i32 : i32, i32
  }
}

</mosaic_0001>

<bundles_post_ra>
// kernel: tpu_custom_call.1
= control target key start
LH: loop header
LB: loop body
LE: loop exit
PB: predicated region body
PF: predicated region fallthrough
CT: control target
= control target key end

     0   :  { %6 = vsyncpa [#allocation3], 0  ;;  %s128_s0 = inlined_call_operand.hbm [shape: f32[8,256], index: 0, kind: input, shape index: {}]   ;;  %s129_s1 = inlined_call_operand.hbm [shape: f32[8,256], index: 1, kind: output, shape index: {}]  }
   0x1   :  { %7 = vsyncpa [#allocation4], 0  ;;  %s13_s8 = sshll.u32 %s128_s0, 4  ;;  %s110_s9 = smov [#allocation2]   ;;  %s14_s8 = int_to_ptr.hbm [resolvable:$true] %s13_s8 }
   0x2   :  { %s15_s10 = sshll.u32 %s110_s9, 4  ;;  %s16_s10 = int_to_ptr.vmem [resolvable:$true] %s15_s10 }
   0x3   :  { %18 = dma.hbm_to_vmem [thread:$0]  %s14_s8, 256, %s16_s10, [#allocation3]  }
   0x4   :  { %106 = dma.done.wait [#allocation3], 256  }
   0x5   :  { %107 = vsyncadd [#allocation3], 4294967040  ;;  %v23_v0 = vld [vmem:[#allocation2] sm:$0xff]  ;;  %v24_v1 = vld [vmem:[#allocation2 + $0x8] sm:$0xff]  ;;  %s111_s11 = smov [#allocation5]   ;;  %s44_s14 = sshll.u32 %s129_s1, 4  ;;  %s45_s14 = int_to_ptr.hbm [resolvable:$true] %s44_s14 }
   0x6   :  { %vm25_vm0 = vcmp.ge.f32.partialorder %v23_v0, 0.0  ;;  %v27_v2 = vmul.f32 0.1, %v23_v0  ;;  %vm26_vm1 = vcmp.ge.f32.partialorder %v24_v1, 0.0  ;;  %v28_v3 = vmul.f32 0.1, %v24_v1 }
   0x7   :  { %s42_s12 = sshll.u32 %s111_s11, 4  ;;  %s43_s12 = int_to_ptr.vmem [resolvable:$true] %s42_s12 }
   0x8   :  { %v29_v4 = vsel %vm25_vm0, %v23_v0, %v27_v2  ;;  %v30_v5 = vsel %vm26_vm1, %v24_v1, %v28_v3 }
   0x9   :  { %v54_v6 = vadd.f32 -0.4, %v29_v4  ;;  %v55_v7 = vadd.f32 -0.4, %v30_v5 }
   0xb   :  { %v33_v8 = vmin.f32 %v54_v6, 6.0  ;;  %v34_v9 = vmin.f32 %v55_v7, 6.0 }
   0xd   :  { %35 = vst [vmem:[#allocation5] sm:$0xff] %v33_v8 }
   0xe   :  { %36 = vst [vmem:[#allocation5 + $0x8] sm:$0xff] %v34_v9 }
   0xf   :  { %47 = dma.vmem_to_hbm [thread:$0]  %s43_s12, 256, %s45_s14, [#allocation4]  }
  0x10   :  { %108 = dma.done.wait [#allocation4], 256  }
  0x11   :  { %109 = vsyncadd [#allocation4], 4294967040 }
  0x12   :  { %52 = vsyncpa [#allocation3], 1 }
  0x13   :  { %53 = vsyncpa [#allocation4], 1 }

</bundles_post_ra>
